<compile_context>
chip_gen: v6e
topology: v6e:2x2x1
jax: 0.10.0
libtpu: 0.0.40
codegen_flags: <defaults>
</compile_context>

<pallas_src>
import functools
import math

import jax
import jax.numpy as jnp
from jax import lax
from jax.experimental import pallas as pl
from jax.experimental.pallas import tpu as pltpu

# The reference file has LORA_CONFIG r=0 which would divide by zero; use a small
# non-degenerate LoRA config for the synthetic kernel.
LORA_R = 4
LORA_ALPHA = 8
LORA_SCALING = LORA_ALPHA / LORA_R
# TODO(synk): nn.Dropout(p=0) is an identity (eval / p=0); no dropout mask is applied.

_DOT_NT = (((1,), (1,)), ((), ()))  # contract last dim of lhs with last dim of rhs


def _lora_kernel_f32_out(x_ref, w_ref, xa_ref, b_ref, o_ref):
    """f32 output: accumulate directly into o_ref, no scratch."""
    k = pl.program_id(2)
    nk = pl.num_programs(2)

    @pl.when(k == 0)
    def _init():
        o_ref[...] = jnp.zeros_like(o_ref)

    # Base projection partial: (tm, tk) @ (tn, tk)^T -> f32 (tm, tn)
    o_ref[...] += lax.dot_general(
        x_ref[...], w_ref[...], _DOT_NT, preferred_element_type=jnp.float32)

    @pl.when(k == nk - 1)
    def _finalize():
        # LoRA second matmul (xa already scaled, f32): (tm, r) @ (tn, r)^T
        o_ref[...] += lax.dot_general(
            xa_ref[...], b_ref[...], _DOT_NT, preferred_element_type=jnp.float32)


def _lora_kernel_lowp_out(x_ref, w_ref, xa_ref, b_ref, o_ref, acc_ref):
    """Low-precision output: f32 VMEM accumulator, cast once at k == last."""
    k = pl.program_id(2)
    nk = pl.num_programs(2)

    @pl.when(k == 0)
    def _init():
        acc_ref[...] = jnp.zeros_like(acc_ref)

    acc_ref[...] += lax.dot_general(
        x_ref[...], w_ref[...], _DOT_NT, preferred_element_type=jnp.float32)

    @pl.when(k == nk - 1)
    def _finalize():
        acc = acc_ref[...] + lax.dot_general(
            xa_ref[...], b_ref[...], _DOT_NT, preferred_element_type=jnp.float32)
        o_ref[...] = acc.astype(o_ref.dtype)


def _round_up(x, m):
    return (x + m - 1) // m * m


def lora_linear(x, weight, lora_A, lora_B, scaling=LORA_SCALING,
                *, tm=512, tn=512, tk=1024, compute_dtype=None):
    """x: (..., in_features); weight: (out, in); lora_A: (r, in); lora_B: (out, r)."""
    out_features, in_features = weight.shape
    r = lora_A.shape[0]
    lead_shape = x.shape[:-1]
    m = math.prod(lead_shape) if lead_shape else 1
    x2d = x.reshape(m, in_features)
    out_dtype = x.dtype

    if compute_dtype is None:
        compute_dtype = x.dtype

    # LoRA first matmul is tiny ((m, in) @ (in, r)); do it in plain JAX, f32,
    # pre-scaled, so the kernel hot loop never touches the r-wide path.
    xa = jnp.dot(x2d.astype(jnp.float32), lora_A.astype(jnp.float32).T) * scaling
    b = lora_B.astype(jnp.float32)            # (out, r), tiny, kept f32

    xw = x2d.astype(compute_dtype)            # (m, in)  MXU operand
    w = weight.astype(compute_dtype)          # (out, in) MXU operand (no transpose)

    # Full-extent blocks for small dims (no padding / (8,128) issue), otherwise
    # pad up to a tile multiple so the grid divides evenly.
    tm = m if m <= tm else tm
    tk = in_features if in_features <= tk else tk
    tn = out_features if out_features <= tn else tn

    mp = _round_up(m, tm)
    kp = _round_up(in_features, tk)
    npad = _round_up(out_features, tn)

    if mp != m or kp != in_features:
        xw = jnp.pad(xw, ((0, mp - m), (0, kp - in_features)))
    if npad != out_features or kp != in_features:
        w = jnp.pad(w, ((0, npad - out_features), (0, kp - in_features)))
    if mp != m:
        xa = jnp.pad(xa, ((0, mp - m), (0, 0)))
    if npad != out_features:
        b = jnp.pad(b, ((0, npad - out_features), (0, 0)))

    gm, gn, gk = mp // tm, npad // tn, kp // tk
    grid = (gm, gn, gk)

    in_item = jnp.dtype(compute_dtype).itemsize
    out_item = jnp.dtype(out_dtype).itemsize
    f32_out = jnp.dtype(out_dtype) == jnp.dtype(jnp.float32)

    # Double-buffered streamed tiles + resident output (+ scratch), 2x headroom,
    # clamped at 48 MiB so it stays safe on v7x's 64 MiB VMEM.
    working = (2 * (tm * tk + tn * tk) * in_item     # x / W tiles (double-buffered)
               + 2 * (tm * r + tn * r) * 4           # xa / B tiles (f32)
               + 2 * tm * tn * out_item              # output tile
               + (0 if f32_out else tm * tn * 4))    # f32 acc scratch
    vmem_bytes = int(min(max(2 * working, 8 * 1024 * 1024), 48 * 1024 * 1024))

    # Kernel-only cost; account for re-streaming across the grid.
    flops = 2 * mp * kp * npad + 2 * mp * r * npad
    bytes_accessed = (xw.size * in_item * gn
                      + w.size * in_item * gm
                      + xa.size * 4 * gn
                      + b.size * 4 * gm
                      + mp * npad * out_item)

    x_spec = pl.BlockSpec((tm, tk), lambda i, j, k: (i, k))
    w_spec = pl.BlockSpec((tn, tk), lambda i, j, k: (j, k))
    xa_spec = pl.BlockSpec((tm, r), lambda i, j, k: (i, 0))
    b_spec = pl.BlockSpec((tn, r), lambda i, j, k: (j, 0))
    o_spec = pl.BlockSpec((tm, tn), lambda i, j, k: (i, j))

    if f32_out:
        kernel = _lora_kernel_f32_out
        scratch_shapes = []
    else:
        kernel = _lora_kernel_lowp_out
        scratch_shapes = [pltpu.VMEM((tm, tn), jnp.float32)]

    out2d = pl.pallas_call(
        kernel,
        out_shape=jax.ShapeDtypeStruct((mp, npad), out_dtype),
        grid=grid,
        in_specs=[x_spec, w_spec, xa_spec, b_spec],
        out_specs=o_spec,
        scratch_shapes=scratch_shapes,
        compiler_params=pltpu.CompilerParams(
            dimension_semantics=("parallel", "parallel", "arbitrary"),
            vmem_limit_bytes=vmem_bytes,
        ),
        cost_estimate=pl.CostEstimate(
            flops=flops, transcendentals=0, bytes_accessed=int(bytes_accessed)),
    )(xw, w, xa, b)

    out2d = out2d[:m, :out_features]
    return out2d.reshape(*lead_shape, out_features)


def _kaiming_uniform(key, shape, a=math.sqrt(5)):
    # torch.nn.init.kaiming_uniform_ with a=sqrt(5): bound = gain * sqrt(3/fan_in)
    fan_in = shape[1]
    gain = math.sqrt(2.0 / (1.0 + a * a))
    bound = gain * math.sqrt(3.0 / fan_in)
    return jax.random.uniform(key, shape, minval=-bound, maxval=bound,
                              dtype=jnp.float32)


if __name__ == "__main__":
    batch, seq = 2, 8
    in_features, out_features = 32, 32

    key = jax.random.PRNGKey(0)
    kx, kw, ka, kb = jax.random.split(key, 4)

    x = jax.random.normal(kx, (batch, seq, in_features), dtype=jnp.float32)

    # Deterministic parameter init matching the module's __init__.
    weight = _kaiming_uniform(kw, (out_features, in_features))     # kaiming_uniform(a=sqrt(5))
    lora_A = _kaiming_uniform(ka, (LORA_R, in_features))           # kaiming_uniform(a=sqrt(5))
    lora_B = jnp.zeros((out_features, LORA_R), dtype=jnp.float32)  # zeros_

    # 1) Module-default params (lora_B == 0), full f32.
    out = lora_linear(x, weight, lora_A, lora_B)
    jax.block_until_ready(out)
    ref = x @ weight.T + LORA_SCALING * ((x @ lora_A.T) @ lora_B.T)
    assert out.shape == (batch, seq, out_features)
    assert jnp.allclose(out, ref, atol=1e-4, rtol=1e-4)

    # 2) Nonzero lora_B to exercise the LoRA path (zeros would mask bugs), f32.
    lora_B_nz = 0.1 * jax.random.normal(kb, (out_features, LORA_R), dtype=jnp.float32)
    out_nz = lora_linear(x, weight, lora_A, lora_B_nz)
    jax.block_until_ready(out_nz)
    ref_nz = x @ weight.T + LORA_SCALING * ((x @ lora_A.T) @ lora_B_nz.T)
    assert jnp.allclose(out_nz, ref_nz, atol=1e-4, rtol=1e-4)

    # 3) bf16 MXU path (f32 accumulation; LoRA path stays f32).
    out_bf = lora_linear(x, weight, lora_A, lora_B_nz, compute_dtype=jnp.bfloat16)
    jax.block_until_ready(out_bf)
    ref_bf = (jnp.dot(x.astype(jnp.bfloat16), weight.astype(jnp.bfloat16).T,
                      preferred_element_type=jnp.float32)
              + LORA_SCALING * ((x @ lora_A.T) @ lora_B_nz.T))
    assert out_bf.dtype == jnp.float32
    assert jnp.allclose(out_bf, ref_bf, atol=1e-2, rtol=1e-2)

    print("KERNEL_OK")
</pallas_src>

<mosaic_0001>
module attributes {stable_mosaic.version = 11 : i64} {
  func.func @_lora_kernel_f32_out(%arg0: i32, %arg1: i32, %arg2: i32, %arg3: memref<16x32xf32, #tpu.memory_space<vmem>>, %arg4: memref<32x32xf32, #tpu.memory_space<vmem>>, %arg5: memref<16x4xf32, #tpu.memory_space<vmem>>, %arg6: memref<32x4xf32, #tpu.memory_space<vmem>>, %arg7: memref<16x32xf32, #tpu.memory_space<vmem>>) attributes {dimension_semantics = [#tpu.dimension_semantics<parallel>, #tpu.dimension_semantics<parallel>, #tpu.dimension_semantics<arbitrary>], iteration_bounds = array<i64: 1, 1, 1>, scalar_prefetch = 0 : i64, scratch_operands = 0 : i64, tpu.core_type = #tpu.core_type<tc>, window_params = [{transform_indices = @transform_0, window_bounds = array<i64: 16, 32>}, {transform_indices = @transform_1, window_bounds = array<i64: 32, 32>}, {transform_indices = @transform_2, window_bounds = array<i64: 16, 4>}, {transform_indices = @transform_3, window_bounds = array<i64: 32, 4>}, {transform_indices = @transform_4, window_bounds = array<i64: 16, 32>}]} {
    %c0_i32 = arith.constant 0 : i32
    %0 = arith.cmpi eq, %arg2, %c0_i32 : i32
    %1 = arith.extui %0 : i1 to i32
    %c0_i32_0 = arith.constant 0 : i32
    %2 = arith.cmpi ne, %1, %c0_i32_0 : i32
    scf.if %2 {
      %cst_10 = arith.constant 0.000000e+00 : f32
      %12 = vector.broadcast %cst_10 : f32 to vector<16x32xf32>
      %c0_11 = arith.constant 0 : index
      %c0_12 = arith.constant 0 : index
      %13 = vector.load %arg7[%c0_11, %c0_12] : memref<16x32xf32, #tpu.memory_space<vmem>>, vector<16x32xf32>
      tpu.vector_store %arg7[%c0_11, %c0_12], %12 {strides = array<i32>} : memref<16x32xf32, #tpu.memory_space<vmem>>, vector<16x32xf32>,
    } else {
    }
    %c0 = arith.constant 0 : index
    %c0_1 = arith.constant 0 : index
    %3 = vector.load %arg7[%c0, %c0_1] : memref<16x32xf32, #tpu.memory_space<vmem>>, vector<16x32xf32>
    %c0_2 = arith.constant 0 : index
    %c0_3 = arith.constant 0 : index
    %4 = vector.load %arg3[%c0_2, %c0_3] : memref<16x32xf32, #tpu.memory_space<vmem>>, vector<16x32xf32>
    %c0_4 = arith.constant 0 : index
    %c0_5 = arith.constant 0 : index
    %5 = vector.load %arg4[%c0_4, %c0_5] : memref<32x32xf32, #tpu.memory_space<vmem>>, vector<32x32xf32>
    %cst = arith.constant dense<0.000000e+00> : vector<16x32xf32>
    %6 = tpu.matmul %4, %5, %cst {dimension_numbers = #tpu.dot_dimension_numbers<[1], [1], [0], [0], [0, 0, 1, 0], [], []>} : vector<16x32xf32>, vector<32x32xf32>, vector<16x32xf32> -> vector<16x32xf32>
    %7 = arith.addf %3, %6 : vector<16x32xf32>
    %c0_6 = arith.constant 0 : index
    %c0_7 = arith.constant 0 : index
    %8 = vector.load %arg7[%c0_6, %c0_7] : memref<16x32xf32, #tpu.memory_space<vmem>>, vector<16x32xf32>
    tpu.vector_store %arg7[%c0_6, %c0_7], %7 {strides = array<i32>} : memref<16x32xf32, #tpu.memory_space<vmem>>, vector<16x32xf32>,
    %c0_i32_8 = arith.constant 0 : i32
    %9 = arith.cmpi eq, %arg2, %c0_i32_8 : i32
    %10 = arith.extui %9 : i1 to i32
    %c0_i32_9 = arith.constant 0 : i32
    %11 = arith.cmpi ne, %10, %c0_i32_9 : i32
    scf.if %11 {
      %c0_10 = arith.constant 0 : index
      %c0_11 = arith.constant 0 : index
      %12 = vector.load %arg7[%c0_10, %c0_11] : memref<16x32xf32, #tpu.memory_space<vmem>>, vector<16x32xf32>
      %c0_12 = arith.constant 0 : index
      %c0_13 = arith.constant 0 : index
      %13 = vector.load %arg5[%c0_12, %c0_13] : memref<16x4xf32, #tpu.memory_space<vmem>>, vector<16x4xf32>
      %c0_14 = arith.constant 0 : index
      %c0_15 = arith.constant 0 : index
      %14 = vector.load %arg6[%c0_14, %c0_15] : memref<32x4xf32, #tpu.memory_space<vmem>>, vector<32x4xf32>
      %cst_16 = arith.constant dense<0.000000e+00> : vector<16x32xf32>
      %15 = tpu.matmul %13, %14, %cst_16 {dimension_numbers = #tpu.dot_dimension_numbers<[1], [1], [0], [0], [0, 0, 1, 0], [], []>} : vector<16x4xf32>, vector<32x4xf32>, vector<16x32xf32> -> vector<16x32xf32>
      %16 = arith.addf %12, %15 : vector<16x32xf32>
      %c0_17 = arith.constant 0 : index
      %c0_18 = arith.constant 0 : index
      %17 = vector.load %arg7[%c0_17, %c0_18] : memref<16x32xf32, #tpu.memory_space<vmem>>, vector<16x32xf32>
      tpu.vector_store %arg7[%c0_17, %c0_18], %16 {strides = array<i32>} : memref<16x32xf32, #tpu.memory_space<vmem>>, vector<16x32xf32>,
    } else {
    }
    return
  }
  func.func @transform_0(%arg0: i32, %arg1: i32, %arg2: i32) -> (i32, i32) {
    %c0_i32 = arith.constant 0 : i32
    return %arg0, %arg2 : i32, i32
  }
  func.func @transform_1(%arg0: i32, %arg1: i32, %arg2: i32) -> (i32, i32) {
    %c0_i32 = arith.constant 0 : i32
    return %arg1, %arg2 : i32, i32
  }
  func.func @transform_2(%arg0: i32, %arg1: i32, %arg2: i32) -> (i32, i32) {
    %c0_i32 = arith.constant 0 : i32
    %c0_i32_0 = arith.constant 0 : i32
    return %arg0, %c0_i32 : i32, i32
  }
  func.func @transform_3(%arg0: i32, %arg1: i32, %arg2: i32) -> (i32, i32) {
    %c0_i32 = arith.constant 0 : i32
    %c0_i32_0 = arith.constant 0 : i32
    return %arg1, %c0_i32 : i32, i32
  }
  func.func @transform_4(%arg0: i32, %arg1: i32, %arg2: i32) -> (i32, i32) {
    %c0_i32 = arith.constant 0 : i32
    return %arg0, %arg1 : i32, i32
  }
}

</mosaic_0001>

<bundles_post_ra>
// kernel: tpu_custom_call.1
= control target key start
LH: loop header
LB: loop body
LE: loop exit
PB: predicated region body
PF: predicated region fallthrough
CT: control target
= control target key end

     0   :  { %vm22_vm0 = vcmask 261120   ;;  %vm142_vm1 = vcmask 31744   ;;  %v328_v4 = vmov 0.0   ;;  %s422_s0 = inlined_call_operand.vmem [shape: f32[16,32], index: 0, kind: input, shape index: {}]   ;;  %s423_s1 = inlined_call_operand.vmem [shape: f32[32,32], index: 1, kind: input, shape index: {}]   ;;  %s424_s2 = inlined_call_operand.vmem [shape: f32[16,4], index: 2, kind: input, shape index: {}]   ;;  %s425_s3 = inlined_call_operand.vmem [shape: f32[32,4], index: 3, kind: input, shape index: {}]   ;;  %s426_s4 = inlined_call_operand.hbm [shape: f32[16,32], index: 4, kind: output, shape index: {}]  }
   0x1   :  { %v32_v0 = vld [vmem:[%s423_s1 + $0x18] sm:$0xff]  ;;  %v31_v1 = vld [vmem:[%s423_s1 + $0x10] sm:$0xff]  ;;  %24 = vst.msk [vmem:[#allocation2 + $0x8] sm:$0xff] %vm22_vm0, %v328_v4  ;;  %23 = vst.msk [vmem:[#allocation2] sm:$0xff] %vm22_vm0, %v328_v4 }
   0x2   :  { %280 = vmatprep.subr.msk.mxu0 %vm22_vm0, %v32_v0  ;;  %v141_v2 = vld [vmem:[%s425_s3 + $0x18] sm:$0xff]  ;;  %v140_v3 = vld [vmem:[%s425_s3 + $0x10] sm:$0xff]  ;;  %v27_v5 = vld [vmem:[%s422_s0] sm:$0xff] }
   0x3   :  { %281 = vmatpush3.xpose.msk.msra.mxu0 %vm22_vm0, %v32_v0  ;;  %291 = vmatprep.subr.msk.mxu1 %vm142_vm1, %v141_v2  ;;  %v136_v6 = vld [vmem:[%s424_s2] sm:$0xff]  ;;  %v30_v7 = vld [vmem:[%s423_s1 + $0x8] sm:$0xff] }
   0x4   :  { %282 = vmatprep.subr.msk.mxu0 %vm22_vm0, %v31_v1  ;;  %292 = vmatpush3.xpose.msk.msra.mxu1 %vm142_vm1, %v141_v2 }
   0x5   :  { %293 = vmatprep.subr.msk.mxu1 %vm142_vm1, %v140_v3  ;;  %288 = vmatprep.mubr.msk.f32.mxu0 %vm22_vm0, %v27_v5 }
   0x6   :  { %9 = vsyncpa [#allocation3], 0  ;;  %v139_v8 = vld [vmem:[%s425_s3 + $0x8] sm:$0xff]  ;;  %299 = vmatprep.mubr.msk.f32.mxu1 %vm142_vm1, %v136_v6  ;;  %v29_v9 = vld [vmem:[%s423_s1] sm:$0xff] }
   0x7   :  { %283 = vmatpush3.xpose.msk.msra.mxu0 %vm22_vm0, %v31_v1  ;;  %v138_v10 = vld [vmem:[%s425_s3] sm:$0xff]  ;;  %v28_v11 = vld [vmem:[%s422_s0 + $0x8] sm:$0xff]  ;;  %s329_s0 = smov [#allocation2]  }
   0x8   :  { %284 = vmatprep.subr.msk.mxu0 %vm22_vm0, %v30_v7  ;;  %294 = vmatpush3.xpose.msk.msra.mxu1 %vm142_vm1, %v140_v3  ;;  %v137_v12 = vld [vmem:[%s424_s2 + $0x8] sm:$0xff]  ;;  %v25_v15 = vld [vmem:[#allocation2] sm:$0xff]  ;;  %s245_s3 = sshll.u32 %s329_s0, 4  ;;  %s246_s3 = int_to_ptr.vmem [resolvable:$true] %s245_s3 }
   0x9   :  { %295 = vmatprep.subr.msk.mxu1 %vm142_vm1, %v139_v8  ;;  %v26_v13 = vld [vmem:[#allocation2 + $0x8] sm:$0xff]  ;;  %s306_s2 = scalar_lea.vmem %s246_s3, 256  ;;  %p311_p1 = scmp.lt.s32.totalorder %s246_s3, %s246_s3 }
   0xa   :  { %p307_p0 = scmp.ne.s32.totalorder %s246_s3, %s306_s2  ;;  %p312_p2 = scmp.lt.s32.totalorder %s306_s2, %s306_s2 }
   0xb   :  { %285 = vmatpush3.xpose.msk.msra.mxu0 %vm22_vm0, %v30_v7 }
   0xc   :  { %286 = vmatprep.subr.msk.mxu0 %vm22_vm0, %v29_v9  ;;  %296 = vmatpush3.xpose.msk.msra.mxu1 %vm142_vm1, %v139_v8  ;;  %p313_p3 = por %p312_p2, %p311_p1 }
   0xd   :  { %297 = vmatprep.subr.msk.mxu1 %vm142_vm1, %v138_v10 }
   0xe   :  { %p314_p4 = pnand %p313_p3, %p307_p0 }
   0xf   :  { %287 = vmatpush3.xpose.msk.msra.mxu0 %vm22_vm0, %v29_v9 }
  0x10   :  { %298 = vmatpush3.xpose.msk.msra.mxu1 %vm142_vm1, %v138_v10 }
  0x12   :  { %289 = vmatmul.mubr.msk.f32.vlgmr.msra.gmra.mxu0 %vm22_vm0, %v28_v11 }
  0x13   :  { %300 = vmatmul.mubr.msk.f32.vlgmr.msra.gmra.mxu1 %vm142_vm1, %v137_v12 }
  0xd2   :  { %v290_v14 = vpop.f32.mrf.mxu0 }
  0xd3   :  { %v128_v16 = vadd.f32 %v290_v14, %v26_v13  ;;  %v301_v19 = vpop.f32.mrf.mxu1 }
  0xd4   :  { %v118_v17 = vpop.f32.mrf.mxu0 }
  0xd5   :  { %130 = vst.msk [vmem:[#allocation2 + $0x8] sm:$0xff] %vm22_vm0, %v128_v16  ;;  %v127_v18 = vadd.f32 %v118_v17, %v25_v15  ;;  %v227_v23 = vpop.f32.mrf.mxu1 }
  0xd7   :  { %129 = vst.msk [vmem:[#allocation2] sm:$0xff] %vm22_vm0, %v127_v18 }
  0xdc   :  { %v135_v20 = vld [vmem:[#allocation2 + $0x8] sm:$0xff] }
  0xdd   :  { %v237_v21 = vadd.f32 %v301_v19, %v135_v20 }
  0xde   :  { %v134_v22 = vld [vmem:[#allocation2] sm:$0xff] }
  0xdf   :  { %239 = vst.msk [vmem:[#allocation2 + $0x8] sm:$0xff] %vm22_vm0, %v237_v21  ;;  %v236_v24 = vadd.f32 %v227_v23, %v134_v22 }
  0xe1   :  { %238 = vst.msk [vmem:[#allocation2] sm:$0xff] %vm22_vm0, %v236_v24 }
  0xe2   :  { %317 = shalt.err (!%p314_p4)
}
  0xe3   :  { %s330_s12 = smov 128   ;;  %s331_s13 = smov 8  }
  0xe4   :  { %251 = dma.vmem_to_hbm [thread:$0]  %s246_s3, 256, %s426_s4, [#allocation3], %s330_s12, %s330_s12, %s331_s13  }
  0xe5   :  { %326 = dma.done.wait [#allocation3], 256  }
  0xe6   :  { %327 = vsyncadd [#allocation3], 4294967040 }
  0xe7   :  { %255 = vsyncpa [#allocation3], 1 }

</bundles_post_ra>
